<compile_context>
chip_gen: v7x
topology: tpu7x:2x2x1
jax: 0.10.0
libtpu: 0.0.40
codegen_flags: <defaults>
</compile_context>

<pallas_src>
import jax
import jax.numpy as jnp
from jax import lax
from jax.experimental import pallas as pl
from jax.experimental.pallas import tpu as pltpu

# ---- small, module-consistent sizes -----------------------------------------
N_HEAD = 2
N_NODES = 8       # n_nodes  -> N
H_SIZE = 32       # h_size   -> hidden dim of H
F_OUT = 16        # f_out_size
BATCH = 2
LN_EPS = 1e-5
LANE = 128

# fused projection column offsets inside the (H_SIZE, LANE) weight rows
Q_OFF = 0                         # Q columns (pre-scaled by F_OUT**-0.5)
K_OFF = N_HEAD * F_OUT            # 32
V_OFF = 2 * N_HEAD * F_OUT        # 64  (V' = output-Linear + w0 already folded in)

# parameter-blob row layout (all rows padded to LANE columns, lane-0 aligned)
W_ROW = 0                               # rows  0..31 : fused Q|K|V' weights (H, 96)
MASK_ROW = W_ROW + H_SIZE               # rows 32..47 : stacked additive mask (2N, N)
ADJ_ROW = MASK_ROW + N_HEAD * N_NODES   # rows 48..63 : stacked (w1/w0)*adj   (2N, N)
BIAS_ROW = ADJ_ROW + N_HEAD * N_NODES   # row  64     : output Linear bias (F,)
GAMMA_ROW = BIAS_ROW + 1                # row  65
BETA_ROW = GAMMA_ROW + 1                # row  66
REST_ROW = BETA_ROW + 1                 # row  67     : LN(bias) row for batches > 0
BLOB_ROWS = 72                          # padded to a sublane multiple


def _layernorm(x, gamma, beta, eps=LN_EPS):
    mean = jnp.mean(x, axis=-1, keepdims=True)
    var = jnp.mean((x - mean) ** 2, axis=-1, keepdims=True)
    return (x - mean) * lax.rsqrt(var + eps) * gamma + beta


# ---- the Pallas kernel: heads + folded output Linear + LayerNorm, full batch --
def neighbor_attention_kernel(h_ref, blob_ref, out_ref):
    x = h_ref[0]                                             # (N, H) batch-0 hidden

    # one fused lane-dense projection: (N, H) @ (H, 128) -> (N, 128)
    # columns: [Q0|Q1|K0|K1|V'0|V'1|zero-pad]
    qkv = jnp.dot(x, blob_ref[W_ROW:W_ROW + H_SIZE, :],
                  preferred_element_type=jnp.float32)

    # per-head scores, stacked along sublanes -> single (2N, N) masked softmax
    scores = []
    for h in range(N_HEAD):                                  # static, fully unrolled
        q = qkv[:, Q_OFF + h * F_OUT:Q_OFF + (h + 1) * F_OUT]   # (N, F), pre-scaled
        k = qkv[:, K_OFF + h * F_OUT:K_OFF + (h + 1) * F_OUT]   # (N, F)
        scores.append(lax.dot_general(q, k, (((1,), (1,)), ((), ())),
                                      preferred_element_type=jnp.float32))
    s = jnp.concatenate(scores, axis=0)                      # (2N, N) sublane stack
    s = s + blob_ref[MASK_ROW:MASK_ROW + N_HEAD * N_NODES, 0:N_NODES]

    m = jnp.max(s, axis=-1, keepdims=True)
    p = jnp.exp(s - m)
    soft = p * pl.reciprocal(jnp.sum(p, axis=-1, keepdims=True), approx=True)
    # (w0*soft + w1*adj) @ V == (soft + (w1/w0)*adj) @ (w0*V')
    wei = soft + blob_ref[ADJ_ROW:ADJ_ROW + N_HEAD * N_NODES, 0:N_NODES]

    # output Linear is folded into V': out = sum_h wei_h @ V'_h + bias
    partials = []
    for h in range(N_HEAD):
        v = qkv[:, V_OFF + h * F_OUT:V_OFF + (h + 1) * F_OUT]    # (N, F)
        partials.append(jnp.dot(wei[h * N_NODES:(h + 1) * N_NODES, :], v,
                                preferred_element_type=jnp.float32))
    acc = partials[0]
    for part in partials[1:]:
        acc = acc + part

    bias = blob_ref[BIAS_ROW:BIAS_ROW + 1, 0:F_OUT]
    gamma = blob_ref[GAMMA_ROW:GAMMA_ROW + 1, 0:F_OUT]
    beta = blob_ref[BETA_ROW:BETA_ROW + 1, 0:F_OUT]
    out_ref[0] = _layernorm(acc + bias, gamma, beta)

    # batches b > 0: every head outputs zeros (PyTorch loop break) -> the output
    # Linear reduces to its bias, then LayerNorm -> constant precomputed row.
    rest = jnp.broadcast_to(blob_ref[REST_ROW:REST_ROW + 1, 0:F_OUT],
                            (N_NODES, F_OUT))
    for b in range(1, out_ref.shape[0]):
        out_ref[b] = rest


# ---- one-time parameter packing (kept OUT of the per-call jit path) ----------
def prepare_params(params, adj):
    """Pack kernel-ready constants into a single (72, 128) f32 VMEM blob:
    fused Q|K|V' weights (scale, w0 and the output Linear folded in), stacked
    additive mask, stacked (w1/w0)*adj, Linear bias, LayerNorm gamma/beta and
    the constant batch>0 output row. Run once at module setup."""
    we = jax.nn.softmax(params["w12"], axis=-1).astype(jnp.float32)   # (NH, 2)
    # robustness checks flagged in review (w0 folded into V' -> division by w0;
    # empty adjacency row -> 0/0 in the softmax reciprocal)
    assert float(jnp.min(we[:, 0])) > 1e-6, "mixing weight w0 underflowed"
    assert float(jnp.min(jnp.sum((adj != 0.0).astype(jnp.int32), axis=1))) > 0, \
        "adjacency row with no neighbour"

    scale = jnp.float32(F_OUT) ** -0.5
    lin_wT = params["lin_w"].T                                        # (NH*F, F)

    # fold score scale into Q; fold output Linear block + w0 into V'
    q_cols = jnp.concatenate(
        [params["wq"][h].T for h in range(N_HEAD)], axis=1) * scale   # (H, NH*F)
    k_cols = jnp.concatenate(
        [params["wk"][h].T for h in range(N_HEAD)], axis=1)           # (H, NH*F)
    v_cols = jnp.concatenate(
        [we[h, 0] * (params["wv"][h].T @ lin_wT[h * F_OUT:(h + 1) * F_OUT, :])
         for h in range(N_HEAD)], axis=1)                             # (H, NH*F)
    w_qkv = jnp.concatenate([q_cols, k_cols, v_cols], axis=1)         # (H, 96)
    w_qkv = jnp.pad(w_qkv, ((0, 0), (0, LANE - w_qkv.shape[1])))      # (H, 128)

    neg_mask = jnp.where(adj == 0.0, jnp.float32(-1e30), jnp.float32(0.0))  # finite -inf
    mask_stacked = jnp.tile(neg_mask, (N_HEAD, 1))                    # (2N, N)
    mask_stacked = jnp.pad(mask_stacked, ((0, 0), (0, LANE - N_NODES)))

    adj_stacked = jnp.concatenate(
        [(we[h, 1] / we[h, 0]) * adj for h in range(N_HEAD)], axis=0)  # (2N, N)
    adj_stacked = jnp.pad(adj_stacked, ((0, 0), (0, LANE - N_NODES)))

    rest_row = _layernorm(params["lin_b"][None, :], params["gamma"][None, :],
                          params["beta"][None, :])[0]                 # (F,)

    small = jnp.zeros((BLOB_ROWS - BIAS_ROW, LANE), jnp.float32)
    small = small.at[0, :F_OUT].set(params["lin_b"])
    small = small.at[1, :F_OUT].set(params["gamma"])
    small = small.at[2, :F_OUT].set(params["beta"])
    small = small.at[3, :F_OUT].set(rest_row)

    blob = jnp.concatenate([w_qkv, mask_stacked, adj_stacked, small], axis=0)
    assert blob.shape == (BLOB_ROWS, LANE), blob.shape
    return blob.astype(jnp.float32)


# ---- wrapper: single 2-input pallas_call, no wrapper-side XLA ops at all ------
@jax.jit
def neighbor_attention_forward(H, blob):
    B, N, _ = H.shape
    vmem = pl.BlockSpec(memory_space=pltpu.MemorySpace.VMEM)
    return pl.pallas_call(
        neighbor_attention_kernel,
        out_shape=jax.ShapeDtypeStruct((B, N, F_OUT), jnp.float32),
        in_specs=[vmem, vmem],
        out_specs=vmem,
    )(H, blob)


# ---- deterministic parameter / graph construction ----------------------------
def init_params(key):
    ks = jax.random.split(key, 6)

    def xavier(k, shape):  # (fan_out, fan_in) like torch Linear weight
        std = (2.0 / (shape[0] + shape[1])) ** 0.5
        return std * jax.random.normal(k, shape, dtype=jnp.float32)

    wq = jnp.stack([xavier(k, (F_OUT, H_SIZE)) for k in jax.random.split(ks[0], N_HEAD)])
    wk = jnp.stack([xavier(k, (F_OUT, H_SIZE)) for k in jax.random.split(ks[1], N_HEAD)])
    wv = jnp.stack([xavier(k, (F_OUT, H_SIZE)) for k in jax.random.split(ks[2], N_HEAD)])
    w12 = jax.random.normal(ks[3], (N_HEAD, 2), dtype=jnp.float32)   # weighting1/2
    lin_w = xavier(ks[4], (F_OUT, N_HEAD * F_OUT))
    bound = 1.0 / (N_HEAD * F_OUT) ** 0.5
    lin_b = jax.random.uniform(ks[5], (F_OUT,), minval=-bound, maxval=bound,
                               dtype=jnp.float32)
    return dict(wq=wq, wk=wk, wv=wv, w12=w12, lin_w=lin_w, lin_b=lin_b,
                gamma=jnp.ones((F_OUT,), jnp.float32),
                beta=jnp.zeros((F_OUT,), jnp.float32))


def make_edge_weights():
    # fixed_edge_weights rows: (node1, node2, edge_feat); ring + two extras so
    # every row of the adjacency has at least one neighbour (no NaN softmax).
    src = jnp.arange(N_NODES)
    dst = (src + 1) % N_NODES
    w = 0.5 + 0.1 * jnp.arange(N_NODES, dtype=jnp.float32)
    node1 = jnp.concatenate([src, jnp.array([0, 3])]).astype(jnp.float32)
    node2 = jnp.concatenate([dst, jnp.array([4, 7])]).astype(jnp.float32)
    ws = jnp.concatenate([w, jnp.array([1.0, 0.7], jnp.float32)])
    return jnp.stack([node1, node2, ws], axis=1)


def calc_adj(edge_weights, n_nodes):
    # mirrors Neighbor_Aggregation.calc_adj (fixed edges, batch dim squeezed;
    # node ids are already 0..N-1 so index == id; sparse COO densified)
    n1 = edge_weights[:, 0].astype(jnp.int32)
    n2 = edge_weights[:, 1].astype(jnp.int32)
    w = edge_weights[:, 2]
    return jnp.zeros((n_nodes, n_nodes), jnp.float32).at[n1, n2].add(w)


# ---- pure-JAX reference (mirrors the PyTorch forward exactly) -----------------
def reference_forward(H, adj, params):
    B, N, _ = H.shape
    x0 = H[0]
    we = jax.nn.softmax(params["w12"], axis=-1)
    heads = []
    for h in range(N_HEAD):
        q = x0 @ params["wq"][h].T
        k = x0 @ params["wk"][h].T
        v = x0 @ params["wv"][h].T
        wei = (q @ k.T) * (F_OUT ** -0.5)
        wei = jnp.where(adj == 0.0, -jnp.inf, wei)
        wei = jax.nn.softmax(wei, axis=-1)
        wei = we[h, 0] * wei + we[h, 1] * adj
        heads.append(wei @ v)
    cat0 = jnp.concatenate(heads, axis=-1)                  # (N, N_HEAD*F)
    if B > 1:
        cat = jnp.concatenate(
            [cat0[None], jnp.zeros((B - 1, N, N_HEAD * F_OUT), jnp.float32)], axis=0)
    else:
        cat = cat0[None]
    lin = cat @ params["lin_w"].T + params["lin_b"]
    return _layernorm(lin, params["gamma"], params["beta"])


if __name__ == "__main__":
    key = jax.random.PRNGKey(0)
    k_h, k_p = jax.random.split(key)
    H = jax.random.normal(k_h, (BATCH, N_NODES, H_SIZE), dtype=jnp.float32)
    params = init_params(k_p)
    edge_weights = make_edge_weights()
    adj = calc_adj(edge_weights, N_NODES)

    blob = prepare_params(params, adj)        # one-time, outside per-call path
    out = neighbor_attention_forward(H, blob)
    out = jax.block_until_ready(out)

    ref = reference_forward(H, adj, params)
    assert out.shape == (BATCH, N_NODES, F_OUT), out.shape
    assert bool(jnp.all(jnp.isfinite(out)))
    assert bool(jnp.allclose(out, ref, atol=2e-2, rtol=2e-2)), \
        float(jnp.max(jnp.abs(out - ref)))
    print("KERNEL_OK")
</pallas_src>

<mosaic_0001>
module attributes {stable_mosaic.version = 11 : i64} {
  func.func @neighbor_attention_kernel(%arg0: memref<2x8x32xf32, #tpu.memory_space<vmem>>, %arg1: memref<72x128xf32, #tpu.memory_space<vmem>>, %arg2: memref<2x8x16xf32, #tpu.memory_space<vmem>>) attributes {dimension_semantics = [], scalar_prefetch = 0 : i64, scratch_operands = 0 : i64, tpu.core_type = #tpu.core_type<tc>} {
    %c0 = arith.constant 0 : index
    %c0_0 = arith.constant 0 : index
    %c0_1 = arith.constant 0 : index
    %0 = vector.load %arg0[%c0, %c0_0, %c0_1] : memref<2x8x32xf32, #tpu.memory_space<vmem>>, vector<1x8x32xf32>
    %1 = vector.shape_cast %0 : vector<1x8x32xf32> to vector<8x32xf32>
    %c0_2 = arith.constant 0 : index
    %c0_3 = arith.constant 0 : index
    %2 = vector.load %arg1[%c0_2, %c0_3] : memref<72x128xf32, #tpu.memory_space<vmem>>, vector<32x128xf32>
    %cst = arith.constant dense<0.000000e+00> : vector<8x128xf32>
    %3 = tpu.matmul %1, %2, %cst {dimension_numbers = #tpu.dot_dimension_numbers<[1], [0], [0], [1], [0, 0, 1, 1], [], []>} : vector<8x32xf32>, vector<32x128xf32>, vector<8x128xf32> -> vector<8x128xf32>
    %4 = vector.extract_strided_slice %3 {offsets = [0, 0], sizes = [8, 16], strides = [1, 1]} : vector<8x128xf32> to vector<8x16xf32>
    %5 = vector.extract_strided_slice %3 {offsets = [0, 32], sizes = [8, 16], strides = [1, 1]} : vector<8x128xf32> to vector<8x16xf32>
    %cst_4 = arith.constant dense<0.000000e+00> : vector<8x8xf32>
    %6 = tpu.matmul %4, %5, %cst_4 {dimension_numbers = #tpu.dot_dimension_numbers<[1], [1], [0], [0], [0, 0, 1, 0], [], []>} : vector<8x16xf32>, vector<8x16xf32>, vector<8x8xf32> -> vector<8x8xf32>
    %7 = vector.extract_strided_slice %3 {offsets = [0, 16], sizes = [8, 16], strides = [1, 1]} : vector<8x128xf32> to vector<8x16xf32>
    %8 = vector.extract_strided_slice %3 {offsets = [0, 48], sizes = [8, 16], strides = [1, 1]} : vector<8x128xf32> to vector<8x16xf32>
    %cst_5 = arith.constant dense<0.000000e+00> : vector<8x8xf32>
    %9 = tpu.matmul %7, %8, %cst_5 {dimension_numbers = #tpu.dot_dimension_numbers<[1], [1], [0], [0], [0, 0, 1, 0], [], []>} : vector<8x16xf32>, vector<8x16xf32>, vector<8x8xf32> -> vector<8x8xf32>
    %10 = tpu.concatenate %6, %9 in 0 : vector<8x8xf32>, vector<8x8xf32> -> vector<16x8xf32>
    %c32 = arith.constant 32 : index
    %c0_6 = arith.constant 0 : index
    %11 = vector.load %arg1[%c32, %c0_6] : memref<72x128xf32, #tpu.memory_space<vmem>>, vector<16x8xf32>
    %12 = arith.addf %10, %11 : vector<16x8xf32>
    %cst_7 = arith.constant dense<0xFF800000> : vector<16xf32>
    %13 = vector.multi_reduction <maximumf>, %12, %cst_7 [1] : vector<16x8xf32> to vector<16xf32>
    %14 = vector.shape_cast %13 : vector<16xf32> to vector<16x1xf32>
    %15 = vector.broadcast %14 : vector<16x1xf32> to vector<16x8xf32>
    %16 = arith.subf %12, %15 : vector<16x8xf32>
    %17 = math.exp %16 : vector<16x8xf32>
    %cst_8 = arith.constant dense<0.000000e+00> : vector<16xf32>
    %18 = vector.multi_reduction <add>, %17, %cst_8 [1] : vector<16x8xf32> to vector<16xf32>
    %19 = vector.shape_cast %18 : vector<16xf32> to vector<16x1xf32>
    %20 = tpu.reciprocal %19 {approx = true} : vector<16x1xf32> -> vector<16x1xf32>
    %21 = vector.broadcast %20 : vector<16x1xf32> to vector<16x8xf32>
    %22 = arith.mulf %17, %21 : vector<16x8xf32>
    %c48 = arith.constant 48 : index
    %c0_9 = arith.constant 0 : index
    %23 = vector.load %arg1[%c48, %c0_9] : memref<72x128xf32, #tpu.memory_space<vmem>>, vector<16x8xf32>
    %24 = arith.addf %22, %23 : vector<16x8xf32>
    %25 = vector.extract_strided_slice %3 {offsets = [0, 64], sizes = [8, 16], strides = [1, 1]} : vector<8x128xf32> to vector<8x16xf32>
    %26 = vector.extract_strided_slice %24 {offsets = [0, 0], sizes = [8, 8], strides = [1, 1]} : vector<16x8xf32> to vector<8x8xf32>
    %cst_10 = arith.constant dense<0.000000e+00> : vector<8x16xf32>
    %27 = tpu.matmul %26, %25, %cst_10 {dimension_numbers = #tpu.dot_dimension_numbers<[1], [0], [0], [1], [0, 0, 1, 1], [], []>} : vector<8x8xf32>, vector<8x16xf32>, vector<8x16xf32> -> vector<8x16xf32>
    %28 = vector.extract_strided_slice %3 {offsets = [0, 80], sizes = [8, 16], strides = [1, 1]} : vector<8x128xf32> to vector<8x16xf32>
    %29 = vector.extract_strided_slice %24 {offsets = [8, 0], sizes = [8, 8], strides = [1, 1]} : vector<16x8xf32> to vector<8x8xf32>
    %cst_11 = arith.constant dense<0.000000e+00> : vector<8x16xf32>
    %30 = tpu.matmul %29, %28, %cst_11 {dimension_numbers = #tpu.dot_dimension_numbers<[1], [0], [0], [1], [0, 0, 1, 1], [], []>} : vector<8x8xf32>, vector<8x16xf32>, vector<8x16xf32> -> vector<8x16xf32>
    %31 = arith.addf %27, %30 : vector<8x16xf32>
    %c64 = arith.constant 64 : index
    %c0_12 = arith.constant 0 : index
    %32 = vector.load %arg1[%c64, %c0_12] : memref<72x128xf32, #tpu.memory_space<vmem>>, vector<1x16xf32>
    %c65 = arith.constant 65 : index
    %c0_13 = arith.constant 0 : index
    %33 = vector.load %arg1[%c65, %c0_13] : memref<72x128xf32, #tpu.memory_space<vmem>>, vector<1x16xf32>
    %c66 = arith.constant 66 : index
    %c0_14 = arith.constant 0 : index
    %34 = vector.load %arg1[%c66, %c0_14] : memref<72x128xf32, #tpu.memory_space<vmem>>, vector<1x16xf32>
    %35 = vector.broadcast %32 : vector<1x16xf32> to vector<8x16xf32>
    %36 = arith.addf %31, %35 : vector<8x16xf32>
    %cst_15 = arith.constant dense<0.000000e+00> : vector<8xf32>
    %37 = vector.multi_reduction <add>, %36, %cst_15 [1] : vector<8x16xf32> to vector<8xf32>
    %38 = vector.shape_cast %37 : vector<8xf32> to vector<8x1xf32>
    %cst_16 = arith.constant 1.600000e+01 : f32
    %39 = vector.broadcast %cst_16 : f32 to vector<8x1xf32>
    %40 = arith.divf %38, %39 : vector<8x1xf32>
    %41 = vector.broadcast %40 : vector<8x1xf32> to vector<8x16xf32>
    %42 = arith.subf %36, %41 : vector<8x16xf32>
    %43 = arith.mulf %42, %42 : vector<8x16xf32>
    %cst_17 = arith.constant dense<0.000000e+00> : vector<8xf32>
    %44 = vector.multi_reduction <add>, %43, %cst_17 [1] : vector<8x16xf32> to vector<8xf32>
    %45 = vector.shape_cast %44 : vector<8xf32> to vector<8x1xf32>
    %cst_18 = arith.constant 1.600000e+01 : f32
    %46 = vector.broadcast %cst_18 : f32 to vector<8x1xf32>
    %47 = arith.divf %45, %46 : vector<8x1xf32>
    %48 = vector.broadcast %40 : vector<8x1xf32> to vector<8x16xf32>
    %49 = arith.subf %36, %48 : vector<8x16xf32>
    %cst_19 = arith.constant 9.99999974E-6 : f32
    %50 = vector.broadcast %cst_19 : f32 to vector<8x1xf32>
    %51 = arith.addf %47, %50 : vector<8x1xf32>
    %52 = math.rsqrt %51 : vector<8x1xf32>
    %53 = vector.broadcast %52 : vector<8x1xf32> to vector<8x16xf32>
    %54 = arith.mulf %49, %53 : vector<8x16xf32>
    %55 = vector.broadcast %33 : vector<1x16xf32> to vector<8x16xf32>
    %56 = arith.mulf %54, %55 : vector<8x16xf32>
    %57 = vector.broadcast %34 : vector<1x16xf32> to vector<8x16xf32>
    %58 = arith.addf %56, %57 : vector<8x16xf32>
    %c0_20 = arith.constant 0 : index
    %c0_21 = arith.constant 0 : index
    %c0_22 = arith.constant 0 : index
    %59 = vector.load %arg2[%c0_20, %c0_21, %c0_22] : memref<2x8x16xf32, #tpu.memory_space<vmem>>, vector<1x8x16xf32>
    %60 = vector.shape_cast %59 : vector<1x8x16xf32> to vector<8x16xf32>
    %61 = vector.shape_cast %58 : vector<8x16xf32> to vector<1x8x16xf32>
    tpu.vector_store %arg2[%c0_20, %c0_21, %c0_22], %61 {strides = array<i32>} : memref<2x8x16xf32, #tpu.memory_space<vmem>>, vector<1x8x16xf32>,
    %c67 = arith.constant 67 : index
    %c0_23 = arith.constant 0 : index
    %62 = vector.load %arg1[%c67, %c0_23] : memref<72x128xf32, #tpu.memory_space<vmem>>, vector<1x16xf32>
    %63 = vector.shape_cast %62 : vector<1x16xf32> to vector<1x16xf32>
    %64 = vector.broadcast %63 : vector<1x16xf32> to vector<8x16xf32>
    %c1 = arith.constant 1 : index
    %c0_24 = arith.constant 0 : index
    %c0_25 = arith.constant 0 : index
    %65 = vector.load %arg2[%c1, %c0_24, %c0_25] : memref<2x8x16xf32, #tpu.memory_space<vmem>>, vector<1x8x16xf32>
    %66 = vector.shape_cast %65 : vector<1x8x16xf32> to vector<8x16xf32>
    %67 = vector.shape_cast %64 : vector<8x16xf32> to vector<1x8x16xf32>
    tpu.vector_store %arg2[%c1, %c0_24, %c0_25], %67 {strides = array<i32>} : memref<2x8x16xf32, #tpu.memory_space<vmem>>, vector<1x8x16xf32>,
    return
  }
}

</mosaic_0001>

<bundles_post_ra>
// kernel: neighbor_attention_forward.1
= control target key start
LH: loop header
LB: loop body
LE: loop exit
PB: predicated region body
PF: predicated region fallthrough
CT: control target
= control target key end

     0   :  { %7 = vsyncpa [#allocation3], 0  ;;  %s764_s0 = inlined_call_operand.hbm [shape: f32[2,8,32], index: 0, kind: input, shape index: {}]   ;;  %s765_s1 = inlined_call_operand.hbm [shape: f32[72,128], index: 1, kind: input, shape index: {}]   ;;  %s766_s2 = inlined_call_operand.hbm [shape: f32[2,8,16], index: 2, kind: output, shape index: {}]  }
   0x1   :  { %8 = vsyncpa [#allocation6], 0 }
   0x2   :  { %9 = vsyncpa [#allocation4], 0  ;;  %s672_s9 = smov [#allocation2]   ;;  %s600_s13 = scalar_lea.hbm %s764_s0, 256 }
   0x3   :  { %s15_s10 = sshll.u32 %s672_s9, 4  ;;  %p601_p0 = scmp.ne.s32.totalorder %s764_s0, %s600_s13  ;;  %s16_s10 = int_to_ptr.vmem [resolvable:$true] %s15_s10 }
   0x4   :  { %p604_p1 = scmp.lt.u32.totalorder %s600_s13, %s764_s0 }
   0x6   :  { %p606_p2 = pnand %p604_p1, %p601_p0 }
   0x8   :  { %609 = shalt.err (!%p606_p2)
}
   0x9   :  { %s610_s18 = scalar_lea.vmem %s16_s10, 256  ;;  %p615_p4 = scmp.lt.s32.totalorder %s16_s10, %s16_s10 }
   0xa   :  { %p611_p3 = scmp.ne.s32.totalorder %s16_s10, %s610_s18  ;;  %p616_p5 = scmp.lt.s32.totalorder %s610_s18, %s610_s18 }
   0xc   :  { %p617_p6 = por %p616_p5, %p615_p4 }
   0xe   :  { %p618_p7 = pnand %p617_p6, %p611_p3 }
  0x10   :  { %621 = shalt.err (!%p618_p7)
}
  0x11   :  { %s673_s19 = smov 128   ;;  %s674_s20 = smov 8  }
  0x12   :  { %21 = dma.hbm_to_vmem [thread:$0]  %s764_s0, 256, %s16_s10, [#allocation3], %s673_s19, %s673_s19, %s674_s20  }
  0x13   :  { %s675_s23 = smov [#allocation5]   ;;  %s622_s27 = scalar_lea.hbm %s765_s1, 1152 }
  0x14   :  { %s27_s24 = sshll.u32 %s675_s23, 4  ;;  %p623_p8 = scmp.ne.s32.totalorder %s765_s1, %s622_s27  ;;  %s28_s24 = int_to_ptr.vmem [resolvable:$true] %s27_s24 }
  0x15   :  { %p626_p9 = scmp.lt.u32.totalorder %s622_s27, %s765_s1 }
  0x17   :  { %p628_p10 = pnand %p626_p9, %p623_p8 }
  0x19   :  { %631 = shalt.err (!%p628_p10)
}
  0x1a   :  { %s632_s4 = scalar_lea.vmem %s28_s24, 1152  ;;  %p637_p12 = scmp.lt.s32.totalorder %s28_s24, %s28_s24 }
  0x1b   :  { %p633_p11 = scmp.ne.s32.totalorder %s28_s24, %s632_s4  ;;  %p638_p13 = scmp.lt.s32.totalorder %s632_s4, %s632_s4 }
  0x1d   :  { %p639_p0 = por %p638_p13, %p637_p12 }
  0x1f   :  { %p640_p1 = pnand %p639_p0, %p633_p11 }
  0x21   :  { %643 = shalt.err (!%p640_p1)
}
  0x22   :  { %33 = dma.hbm_to_vmem [thread:$0]  %s765_s1, 1152, %s28_s24, [#allocation6], %s673_s19, %s673_s19, %s674_s20  }
  0x23   :  { %666 = dma.done.wait [#allocation3], 256  }
  0x24   :  { %667 = vsyncadd [#allocation3], 4294967040 }
  0x25   :  { %668 = dma.done.wait [#allocation6], 1152  }
  0x26   :  { %669 = vsyncadd [#allocation6], 4294966144  ;;  %v676_v0 = vmov 0.0|0.0   ;;  %vm677_vm0 = vmmov 0   ;;  %v678_v1 = vmov 0.0   ;;  %v41_v2 = vld [vmem:[#allocation5] sm:$0xff] }
  0x27   :  { %571 = vmatprep.subr.bf16.mxu0 %v676_v0  ;;  %548 = vmatprep.mubr.msk.f32.mxu0 %vm677_vm0, %v678_v1  ;;  %v42_v3 = vld [vmem:[#allocation5 + $0x8] sm:$0xff]  ;;  %v43_v4 = vld [vmem:[#allocation5 + $0x10] sm:$0xff]  ;;  %v44_v6 = vld [vmem:[#allocation5 + $0x18] sm:$0xff]  ;;  %vm45_vm1 = vcmask 261120   ;;  %s679_s1 = smov 112   ;;  %s680_s6 = smov 96  }
  0x28   :  { %551 = vmatprep.subr.mxu1 %v678_v1  ;;  %553 = vmatprep.mubr.msk.f32.mxu1 %vm677_vm0, %v678_v1  ;;  %v572_v5 = vpack.c.bf16 %v42_v3, %v41_v2  ;;  %v575_v7 = vpack.c.bf16 %v44_v6, %v43_v4  ;;  %v40_v8 = vld [vmem:[#allocation2] sm:$0xff]  ;;  %s681_s7 = smov 80   ;;  %vm122_vm2 = vcmask 130048   ;;  %v275_v14 = vld [vmem:[#allocation5 + $0x20] sm:$0xff]  ;;  %vm279_vm3 = vcmask 64512   ;;  %v276_v18 = vld [vmem:[#allocation5 + $0x28] sm:$0xff] }
  0x29   :  { %s682_s8 = smov 64   ;;  %s683_s9 = smov 48   ;;  %v302_v39 = vld [vmem:[#allocation5 + $0x30] sm:$0xff]  ;;  %v303_v43 = vld [vmem:[#allocation5 + $0x38] sm:$0xff]  ;;  %v523_v49 = vld [vmem:[#allocation5 + $0x40] ss:$0 sm:$0xff] }
  0x2a   :  { %573 = vmatpush3.bf16.msra.mxu0 %v572_v5  ;;  %v526_v59 = vld [vmem:[#allocation5 + $0x43] ss:$0 sm:$0xff]  ;;  %v525_v2 = vld [vmem:[#allocation5 + $0x42] ss:$0 sm:$0xff]  ;;  %s684_s10 = smov [#allocation7]  }
  0x2b   :  { %574 = vmatprep.subr.bf16.mxu0 %v676_v0  ;;  %497 = vst.msk [vmem:[#allocation7 + $0x8] sm:$0xff] %vm122_vm2, %v526_v59  ;;  %v524_v0 = vld [vmem:[#allocation5 + $0x41] ss:$0 sm:$0xff]  ;;  %s503_s11 = sshll.u32 %s684_s10, 4  ;;  %s504_s11 = int_to_ptr.vmem [resolvable:$true] %s503_s11 }
  0x2c   :  { %s644_s12 = scalar_lea.vmem %s504_s11, 256  ;;  %p649_p3 = scmp.lt.s32.totalorder %s504_s11, %s504_s11 }
  0x2d   :  { %p645_p2 = scmp.ne.s32.totalorder %s504_s11, %s644_s12  ;;  %p650_p4 = scmp.lt.s32.totalorder %s644_s12, %s644_s12 }
  0x2e   :  { %576 = vmatpush3.bf16.msra.mxu0 %v575_v7 }
  0x2f   :  { %561 = vmatprep.subr.mxu0 %v678_v1  ;;  %p651_p5 = por %p650_p4, %p649_p3 }
  0x31   :  { %549 = vmatmul.mubr.msk.f32.vlgmr.msra.gmra.mrb[0].mxu0 %vm45_vm1, %v40_v8  ;;  %p652_p6 = pnand %p651_p5, %p645_p2 }
  0x32   :  { %563 = vmatprep.mubr.msk.f32.mxu0 %vm677_vm0, %v678_v1 }
 0x104   :  { %v115_v9 = vpop.f32.mrb[0].mxu0 }
 0x105   :  { %197 = vrot.lane.b32.xlu1 %v115_v9, %s679_s1  ;;  %120 = vrot.lane.b32.xlu0 %v115_v9, %s680_s6  ;;  %v550_v10 = vpop.f32.mrb[1].mxu0 }
 0x109   :  { %199 = vrot.lane.b32.xlu0 %v115_v9, %s681_s7 }
 0x177   :  { %v121_v11 = vpop.permute.xlu0 %120  ;;  %v198_v13 = vpop.permute.xlu1 %197 }
 0x178   :  { %552 = vmatpush3.xpose.msk.msra.mxu1 %vm122_vm2, %v121_v11 }
 0x179   :  { %556 = vmatprep.subr.mxu1 %v678_v1 }
 0x17b   :  { %554 = vmatmul.mubr.msk.f32.vlgmr.msra.gmra.mrb[0].mxu1 %vm122_vm2, %v115_v9  ;;  %v200_v12 = vpop.permute.xlu0 %199 }
 0x17c   :  { %557 = vmatpush3.xpose.msk.msra.mxu1 %vm122_vm2, %v200_v12  ;;  %558 = vmatprep.mubr.msk.f32.mxu1 %vm677_vm0, %v678_v1 }
 0x17d   :  { %566 = vmatprep.subr.mxu1 %v678_v1 }
 0x17f   :  { %559 = vmatmul.mubr.msk.f32.vlgmr.msra.gmra.mrb[2].mxu1 %vm122_vm2, %v198_v13 }
 0x180   :  { %568 = vmatprep.mubr.msk.f32.mxu1 %vm677_vm0, %v678_v1 }
 0x24e   :  { %v193_v15 = vpop.f32.mrb[0].mxu1 }
 0x24f   :  { %v277_v16 = vadd.f32 %v275_v14, %v193_v15  ;;  %v555_v17 = vpop.f32.mrb[1].mxu1 }
 0x251   :  { %v280_v19 = vsel %vm279_vm3, %v277_v16, -inf }
 0x252   :  { %281 = vmax.xlane.f32.xlu1 %v280_v19  ;;  %v271_v20 = vpop.f32.mrb[2].mxu1 }
 0x253   :  { %v278_v21 = vadd.f32 %v276_v18, %v271_v20  ;;  %v560_v22 = vpop.f32.mrb[3].mxu1 }
 0x255   :  { %v283_v23 = vsel %vm279_vm3, %v278_v21, -inf }
 0x256   :  { %284 = vmax.xlane.f32.xlu0 %v283_v23 }
 0x2df   :  { %v282_v24 = vpop.xlane.xlu1 %281 }
 0x2e0   :  { %v286_v25 = vsub.f32 %v277_v16, %v282_v24 }
 0x2e2   :  { %v288_v26 = vmul.f32 1.442695, %v286_v25 }
 0x2e3   :  { %v285_v27 = vpop.xlane.xlu0 %284 }
 0x2e4   :  { %590 = vpow2.f32 %v288_v26  ;;  %v287_v28 = vsub.f32 %v278_v21, %v285_v27 }
 0x2e6   :  { %v290_v29 = vmul.f32 1.442695, %v287_v28 }
 0x2e8   :  { %592 = vpow2.f32 %v290_v29 }
 0x2ee   :  { %v591_v30 = vpop.eup %590 }
 0x2ef   :  { %v292_v31 = vsel %vm279_vm3, %v591_v30, 0.0 }
 0x2f0   :  { %293 = vadd.xlane.f32.xlu0 %v292_v31 }
 0x2f2   :  { %v593_v32 = vpop.eup %592 }
 0x2f3   :  { %v295_v33 = vsel %vm279_vm3, %v593_v32, 0.0 }
 0x2f4   :  { %296 = vadd.xlane.f32.xlu1 %v295_v33 }
 0x305   :  { %382 = vrot.lane.b32.xlu1 %v115_v9, %s682_s8 }
 0x306   :  { %306 = vrot.lane.b32.xlu0 %v115_v9, %s683_s9 }
 0x37d   :  { %v294_v34 = vpop.xlane.xlu0 %293 }
 0x37e   :  { %594 = vrcp.f32 %v294_v34 }
 0x381   :  { %v297_v35 = vpop.xlane.xlu1 %296  ;;  %v307_v36 = vpop.permute.xlu0 %306 }
 0x382   :  { %596 = vrcp.f32 %v297_v35  ;;  %562 = vmatpush3.msra.mxu0 %v307_v36 }
 0x385   :  { %v383_v37 = vpop.permute.xlu1 %382 }
 0x386   :  { %567 = vmatpush3.msra.mxu1 %v383_v37 }
 0x388   :  { %v595_v38 = vpop.eup %594 }
 0x389   :  { %v300_v40 = vmul.f32 %v595_v38, %v591_v30 }
 0x38b   :  { %v304_v41 = vadd.f32 %v302_v39, %v300_v40 }
 0x38c   :  { %v597_v42 = vpop.eup %596 }
 0x38d   :  { %v301_v44 = vmul.f32 %v597_v42, %v593_v32  ;;  %569 = vmatmul.mubr.msk.f32.vlgmr.msra.gmra.mrb[4].mxu1 %vm279_vm3, %v304_v41 }
 0x38f   :  { %v305_v45 = vadd.f32 %v303_v43, %v301_v44 }
 0x391   :  { %564 = vmatmul.mubr.msk.f32.vlgmr.msra.gmra.mrb[2].mxu0 %vm279_vm3, %v305_v45 }
 0x460   :  { %v454_v46 = vpop.f32.mrb[4].mxu1 }
 0x461   :  { %v570_v47 = vpop.f32.mrb[5].mxu1 }
 0x464   :  { %v378_v48 = vpop.f32.mrb[2].mxu0 }
 0x465   :  { %v455_v50 = vadd.f32 %v454_v46, %v378_v48  ;;  %v565_v51 = vpop.f32.mrb[3].mxu0 }
 0x467   :  { %v465_v52 = vadd.f32 %v523_v49, %v455_v50 }
 0x469   :  { %v466_v53 = vsel %vm122_vm2, %v465_v52, 0.0 }
 0x46a   :  { %467 = vadd.xlane.f32.xlu1 %v466_v53 }
 0x4f7   :  { %v468_v54 = vpop.xlane.xlu1 %467 }
 0x4f8   :  { %v470_v55 = vmul.f32 0.0625, %v468_v54 }
 0x4fa   :  { %v471_v56 = vsub.f32 %v465_v52, %v470_v55 }
 0x4fc   :  { %v472_v57 = vmul.f32 %v471_v56, %v471_v56 }
 0x4fe   :  { %v473_v58 = vsel %vm122_vm2, %v472_v57, 0.0 }
 0x4ff   :  { %474 = vadd.xlane.f32.xlu0 %v473_v58 }
 0x58c   :  { %v475_v60 = vpop.xlane.xlu0 %474 }
 0x58d   :  { %v476_v61 = vmul.f32 0.0625, %v475_v60 }
 0x58f   :  { %v477_v62 = vadd.f32 1e-05, %v476_v61 }
 0x591   :  { %598 = vrsqrt.f32 %v477_v62 }
 0x59b   :  { %v599_v63 = vpop.eup %598 }
 0x59c   :  { %v479_v1 = vmul.f32 %v599_v63, %v471_v56 }
 0x59e   :  { %v484_v3 = vmul.f32 %v524_v0, %v479_v1 }
 0x5a0   :  { %v489_v4 = vadd.f32 %v525_v2, %v484_v3 }
 0x5a2   :  { %490 = vst.msk [vmem:[#allocation7] sm:$0xff] %vm122_vm2, %v489_v4 }
 0x5a3   :  { %655 = shalt.err (!%p652_p6)
}
 0x5a4   :  { %s656_s15 = scalar_lea.hbm %s766_s2, 256 }
 0x5a5   :  { %p657_p7 = scmp.ne.s32.totalorder %s766_s2, %s656_s15  ;;  %p660_p8 = scmp.lt.u32.totalorder %s656_s15, %s766_s2 }
 0x5a7   :  { %p662_p9 = pnand %p660_p8, %p657_p7 }
 0x5a9   :  { %665 = shalt.err (!%p662_p9)
}
 0x5aa   :  { %509 = dma.vmem_to_hbm [thread:$0]  %s504_s11, 256, %s766_s2, [#allocation4], %s673_s19, %s673_s19, %s674_s20  }
 0x5ab   :  { %670 = dma.done.wait [#allocation4], 256  }
 0x5ac   :  { %671 = vsyncadd [#allocation4], 4294967040 }
 0x5ad   :  { %513 = vsyncpa [#allocation3], 1 }
 0x5ae   :  { %514 = vsyncpa [#allocation6], 1 }
 0x5af   :  { %515 = vsyncpa [#allocation4], 1 }

</bundles_post_ra>
